<compile_context>
chip_gen: v7x
topology: tpu7x:2x2x1
jax: 0.10.0
libtpu: 0.0.40
codegen_flags: <defaults>
</compile_context>

<pallas_src>
import functools

import jax
import jax.numpy as jnp
from jax.experimental import pallas as pl
from jax.experimental.pallas import tpu as pltpu

EPS = 1e-6


def _sublayer_connection_kernel(x_ref, a2_ref, b2_ref, w_ref, bias_ref, o_ref,
                                normed_ref, *, eps, tile_cols):
    """x_ref: (tm, H) row tile; w_ref: (H, tn) column slab; o_ref: (tm, tn)."""
    j = pl.program_id(1)

    # --- LayerNorm once per row tile (j == 0), cached in bf16 scratch ---------
    @pl.when(j == 0)
    def _():
        x = x_ref[...].astype(jnp.float32)
        h = x.shape[-1]
        a2 = a2_ref[...].astype(jnp.float32)
        b2 = b2_ref[...].astype(jnp.float32)

        mean = jnp.mean(x, axis=-1, keepdims=True)
        xc = x - mean
        var_unbiased = jnp.sum(xc * xc, axis=-1, keepdims=True) / (h - 1)
        std = jnp.sqrt(var_unbiased)
        inv = pl.reciprocal(std + eps, approx=True)   # EUP slot (free-ish)
        normed_ref[...] = (a2 * xc * inv + b2).astype(jnp.bfloat16)

    # --- sublayer: Linear(H, tn) on the MXU, bf16 in / f32 accumulate ---------
    sub = jnp.dot(normed_ref[...], w_ref[...],
                  preferred_element_type=jnp.float32)
    sub = sub + bias_ref[...].astype(jnp.float32)

    # --- dropout (eval mode => identity) + residual ----------------------------
    if tile_cols == x_ref.shape[-1]:           # single column slab: whole tile
        x_cols = x_ref[...]
    else:
        start = pl.multiple_of(j * tile_cols, tile_cols)
        x_cols = x_ref[:, pl.ds(start, tile_cols)]
    o_ref[...] = (x_cols.astype(jnp.float32) + sub).astype(o_ref.dtype)


def _pick_row_tile(rows, target):
    """Largest multiple of 8 that divides `rows` and is <= target."""
    tm = min(target, rows)
    tm -= tm % 8
    while tm > 8 and rows % tm != 0:
        tm -= 8
    assert tm >= 8 and tm % 8 == 0 and rows % tm == 0
    return tm


def _pick_col_tile(h, w_slab_budget_bytes=16 << 20):
    """Full-width W if the bf16 slab is small; else a 128-multiple column slab."""
    for tn in (h, 2048, 1024, 512, 256, 128):
        if tn > h or h % tn != 0:
            continue
        if tn != h and tn % 128 != 0:
            continue
        if 2 * h * tn * 2 <= w_slab_budget_bytes:   # double-buffered bf16 slab
            return tn
    return h  # fall back to full width (may need a larger vmem limit)


def sublayer_connection(x, a2, b2, w, bias, *, eps=EPS, tile_rows=512):
    """x: (B, S, H). Returns x + Linear(LayerNorm(x))  (dropout in eval mode)."""
    b, s, h = x.shape
    rows = b * s
    assert rows % 8 == 0, "batch*seq must be a multiple of 8"

    x2d = x.reshape(rows, h)
    a2_2d = a2.reshape(1, h).astype(jnp.float32)
    b2_2d = b2.reshape(1, h).astype(jnp.float32)
    bias_2d = bias.reshape(1, h).astype(jnp.float32)
    w_bf16 = w.astype(jnp.bfloat16)            # halve weight DMA / VMEM cost

    tm = _pick_row_tile(rows, tile_rows)
    tn = _pick_col_tile(h)
    grid = (rows // tm, h // tn)

    # VMEM budget (double-buffered tiles + resident scratch), with headroom,
    # capped at 64 MiB so the same config also fits v7x.
    itemsize = jnp.dtype(x.dtype).itemsize
    est = (2 * tm * h * itemsize           # x row tiles
           + 2 * tm * tn * itemsize        # output tiles
           + 2 * h * tn * 2                # bf16 weight slab
           + 2 * 3 * h * 4                 # a2 / b2 / bias
           + tm * h * 2)                   # bf16 normed scratch
    vmem_limit = int(min(max(2 * est, 32 << 20), 64 << 20))

    out2d = pl.pallas_call(
        functools.partial(_sublayer_connection_kernel, eps=eps, tile_cols=tn),
        out_shape=jax.ShapeDtypeStruct((rows, h), x.dtype),
        grid=grid,
        in_specs=[
            pl.BlockSpec((tm, h), lambda i, j: (i, 0)),   # x row tile (resident over j)
            pl.BlockSpec((1, h), lambda i, j: (0, 0)),    # a_2 (LN gain)
            pl.BlockSpec((1, h), lambda i, j: (0, 0)),    # b_2 (LN bias)
            pl.BlockSpec((h, tn), lambda i, j: (0, j)),   # weight column slab
            pl.BlockSpec((1, tn), lambda i, j: (0, j)),   # linear bias slab
        ],
        out_specs=pl.BlockSpec((tm, tn), lambda i, j: (i, j)),
        scratch_shapes=[pltpu.VMEM((tm, h), jnp.bfloat16)],   # cached LN output
        compiler_params=pltpu.CompilerParams(
            dimension_semantics=("parallel", "arbitrary"),
            vmem_limit_bytes=vmem_limit),
    )(x2d, a2_2d, b2_2d, w_bf16, bias_2d)

    return out2d.reshape(b, s, h)


def _reference(x, a2, b2, w, bias, eps=EPS):
    """Same math; matmul also in bf16 (f32 accum) to match the kernel's dtype plan."""
    h = x.shape[-1]
    mean = jnp.mean(x, axis=-1, keepdims=True)
    xc = x - mean
    std = jnp.sqrt(jnp.sum(xc * xc, axis=-1, keepdims=True) / (h - 1))
    normed = a2 * xc / (std + eps) + b2
    sub = jnp.dot(normed.astype(jnp.bfloat16), w.astype(jnp.bfloat16),
                  preferred_element_type=jnp.float32) + bias
    return x + sub


if __name__ == "__main__":
    key = jax.random.PRNGKey(0)
    batch, seq, hidden = 2, 8, 32

    kx, kw, kb = jax.random.split(key, 3)
    x = jax.random.normal(kx, (batch, seq, hidden), dtype=jnp.float32)

    # LayerNorm params (module init: ones / zeros)
    a2 = jnp.ones((hidden,), jnp.float32)
    b2 = jnp.zeros((hidden,), jnp.float32)

    # Deterministic sublayer = Linear(hidden, hidden)
    w = jax.random.normal(kw, (hidden, hidden), jnp.float32) * (1.0 / hidden ** 0.5)
    bias = jax.random.normal(kb, (hidden,), jnp.float32) * 0.01

    out = sublayer_connection(x, a2, b2, w, bias)
    out = jax.block_until_ready(out)

    ref = _reference(x, a2, b2, w, bias)
    assert out.shape == (batch, seq, hidden)
    # Tolerance covers the approx (EUP) reciprocal in the LN divide (~1e-3 rel)
    # plus one-ulp bf16 rounding differences feeding the matmul.
    assert jnp.allclose(out, ref, atol=3e-2, rtol=3e-2), "mismatch vs reference"

    print("KERNEL_OK")
</pallas_src>

<mosaic_0001>
module attributes {stable_mosaic.version = 11 : i64} {
  func.func @_sublayer_connection_kernel(%arg0: i32, %arg1: i32, %arg2: memref<16x32xf32, #tpu.memory_space<vmem>>, %arg3: memref<1x32xf32, #tpu.memory_space<vmem>>, %arg4: memref<1x32xf32, #tpu.memory_space<vmem>>, %arg5: memref<32x32xbf16, #tpu.memory_space<vmem>>, %arg6: memref<1x32xf32, #tpu.memory_space<vmem>>, %arg7: memref<16x32xf32, #tpu.memory_space<vmem>>, %arg8: memref<16x32xbf16, #tpu.memory_space<vmem>>) attributes {dimension_semantics = [#tpu.dimension_semantics<parallel>, #tpu.dimension_semantics<arbitrary>], iteration_bounds = array<i64: 1, 1>, scalar_prefetch = 0 : i64, scratch_operands = 1 : i64, tpu.core_type = #tpu.core_type<tc>, window_params = [{transform_indices = @transform_0, window_bounds = array<i64: 16, 32>}, {pipeline_mode = #tpu.pipeline_mode<synchronous>, transform_indices = @transform_1, window_bounds = array<i64: 1, 32>}, {pipeline_mode = #tpu.pipeline_mode<synchronous>, transform_indices = @transform_2, window_bounds = array<i64: 1, 32>}, {transform_indices = @transform_3, window_bounds = array<i64: 32, 32>}, {transform_indices = @transform_4, window_bounds = array<i64: 1, 32>}, {transform_indices = @transform_5, window_bounds = array<i64: 16, 32>}]} {
    %c0_i32 = arith.constant 0 : i32
    %0 = arith.cmpi eq, %arg1, %c0_i32 : i32
    %1 = arith.extui %0 : i1 to i32
    %c0_i32_0 = arith.constant 0 : i32
    %2 = arith.cmpi ne, %1, %c0_i32_0 : i32
    scf.if %2 {
      %c0_10 = arith.constant 0 : index
      %c0_11 = arith.constant 0 : index
      %12 = vector.load %arg2[%c0_10, %c0_11] : memref<16x32xf32, #tpu.memory_space<vmem>>, vector<16x32xf32>
      %c0_12 = arith.constant 0 : index
      %c0_13 = arith.constant 0 : index
      %13 = vector.load %arg3[%c0_12, %c0_13] : memref<1x32xf32, #tpu.memory_space<vmem>>, vector<1x32xf32>
      %c0_14 = arith.constant 0 : index
      %c0_15 = arith.constant 0 : index
      %14 = vector.load %arg4[%c0_14, %c0_15] : memref<1x32xf32, #tpu.memory_space<vmem>>, vector<1x32xf32>
      %cst_16 = arith.constant dense<0.000000e+00> : vector<16xf32>
      %15 = vector.multi_reduction <add>, %12, %cst_16 [1] : vector<16x32xf32> to vector<16xf32>
      %16 = vector.shape_cast %15 : vector<16xf32> to vector<16x1xf32>
      %cst_17 = arith.constant 3.200000e+01 : f32
      %17 = vector.broadcast %cst_17 : f32 to vector<16x1xf32>
      %18 = arith.divf %16, %17 : vector<16x1xf32>
      %19 = vector.broadcast %18 : vector<16x1xf32> to vector<16x32xf32>
      %20 = arith.subf %12, %19 : vector<16x32xf32>
      %21 = arith.mulf %20, %20 : vector<16x32xf32>
      %cst_18 = arith.constant dense<0.000000e+00> : vector<16xf32>
      %22 = vector.multi_reduction <add>, %21, %cst_18 [1] : vector<16x32xf32> to vector<16xf32>
      %23 = vector.shape_cast %22 : vector<16xf32> to vector<16x1xf32>
      %cst_19 = arith.constant 3.100000e+01 : f32
      %24 = vector.broadcast %cst_19 : f32 to vector<16x1xf32>
      %25 = arith.divf %23, %24 : vector<16x1xf32>
      %26 = math.sqrt %25 : vector<16x1xf32>
      %cst_20 = arith.constant 9.99999997E-7 : f32
      %27 = vector.broadcast %cst_20 : f32 to vector<16x1xf32>
      %28 = arith.addf %26, %27 : vector<16x1xf32>
      %29 = tpu.reciprocal %28 {approx = true} : vector<16x1xf32> -> vector<16x1xf32>
      %30 = vector.broadcast %13 : vector<1x32xf32> to vector<16x32xf32>
      %31 = arith.mulf %30, %20 : vector<16x32xf32>
      %32 = vector.broadcast %29 : vector<16x1xf32> to vector<16x32xf32>
      %33 = arith.mulf %31, %32 : vector<16x32xf32>
      %34 = vector.broadcast %14 : vector<1x32xf32> to vector<16x32xf32>
      %35 = arith.addf %33, %34 : vector<16x32xf32>
      %36 = arith.truncf %35 : vector<16x32xf32> to vector<16x32xbf16>
      %c0_21 = arith.constant 0 : index
      %c0_22 = arith.constant 0 : index
      %37 = vector.load %arg8[%c0_21, %c0_22] : memref<16x32xbf16, #tpu.memory_space<vmem>>, vector<16x32xbf16>
      tpu.vector_store %arg8[%c0_21, %c0_22], %36 {strides = array<i32>} : memref<16x32xbf16, #tpu.memory_space<vmem>>, vector<16x32xbf16>,
    } else {
    }
    %c0 = arith.constant 0 : index
    %c0_1 = arith.constant 0 : index
    %3 = vector.load %arg8[%c0, %c0_1] : memref<16x32xbf16, #tpu.memory_space<vmem>>, vector<16x32xbf16>
    %c0_2 = arith.constant 0 : index
    %c0_3 = arith.constant 0 : index
    %4 = vector.load %arg5[%c0_2, %c0_3] : memref<32x32xbf16, #tpu.memory_space<vmem>>, vector<32x32xbf16>
    %cst = arith.constant dense<0.000000e+00> : vector<16x32xf32>
    %5 = tpu.matmul %3, %4, %cst {dimension_numbers = #tpu.dot_dimension_numbers<[1], [0], [0], [1], [0, 0, 1, 1], [], []>} : vector<16x32xbf16>, vector<32x32xbf16>, vector<16x32xf32> -> vector<16x32xf32>
    %c0_4 = arith.constant 0 : index
    %c0_5 = arith.constant 0 : index
    %6 = vector.load %arg6[%c0_4, %c0_5] : memref<1x32xf32, #tpu.memory_space<vmem>>, vector<1x32xf32>
    %7 = vector.broadcast %6 : vector<1x32xf32> to vector<16x32xf32>
    %8 = arith.addf %5, %7 : vector<16x32xf32>
    %c0_6 = arith.constant 0 : index
    %c0_7 = arith.constant 0 : index
    %9 = vector.load %arg2[%c0_6, %c0_7] : memref<16x32xf32, #tpu.memory_space<vmem>>, vector<16x32xf32>
    %10 = arith.addf %9, %8 : vector<16x32xf32>
    %c0_8 = arith.constant 0 : index
    %c0_9 = arith.constant 0 : index
    %11 = vector.load %arg7[%c0_8, %c0_9] : memref<16x32xf32, #tpu.memory_space<vmem>>, vector<16x32xf32>
    tpu.vector_store %arg7[%c0_8, %c0_9], %10 {strides = array<i32>} : memref<16x32xf32, #tpu.memory_space<vmem>>, vector<16x32xf32>,
    return
  }
  func.func @transform_0(%arg0: i32, %arg1: i32) -> (i32, i32) {
    %c0_i32 = arith.constant 0 : i32
    %c0_i32_0 = arith.constant 0 : i32
    return %arg0, %c0_i32 : i32, i32
  }
  func.func @transform_1(%arg0: i32, %arg1: i32) -> (i32, i32) {
    %c0_i32 = arith.constant 0 : i32
    %c0_i32_0 = arith.constant 0 : i32
    %c0_i32_1 = arith.constant 0 : i32
    return %c0_i32, %c0_i32_0 : i32, i32
  }
  func.func @transform_2(%arg0: i32, %arg1: i32) -> (i32, i32) {
    %c0_i32 = arith.constant 0 : i32
    %c0_i32_0 = arith.constant 0 : i32
    %c0_i32_1 = arith.constant 0 : i32
    return %c0_i32, %c0_i32_0 : i32, i32
  }
  func.func @transform_3(%arg0: i32, %arg1: i32) -> (i32, i32) {
    %c0_i32 = arith.constant 0 : i32
    %c0_i32_0 = arith.constant 0 : i32
    return %c0_i32, %arg1 : i32, i32
  }
  func.func @transform_4(%arg0: i32, %arg1: i32) -> (i32, i32) {
    %c0_i32 = arith.constant 0 : i32
    %c0_i32_0 = arith.constant 0 : i32
    return %c0_i32, %arg1 : i32, i32
  }
  func.func @transform_5(%arg0: i32, %arg1: i32) -> (i32, i32) {
    %c0_i32 = arith.constant 0 : i32
    return %arg0, %arg1 : i32, i32
  }
}

</mosaic_0001>

<bundles_post_ra>
// kernel: tpu_custom_call.1
= control target key start
LH: loop header
LB: loop body
LE: loop exit
PB: predicated region body
PF: predicated region fallthrough
CT: control target
= control target key end

     0   :  { %10 = vsyncpa [#allocation4], 0  ;;  %s428_s0 = inlined_call_operand.hbm [shape: f32[16,32], index: 0, kind: input, shape index: {}]   ;;  %s429_s1 = inlined_call_operand.vmem [shape: f32[1,32], index: 1, kind: input, shape index: {}]   ;;  %s430_s2 = inlined_call_operand.vmem [shape: f32[1,32], index: 2, kind: input, shape index: {}]   ;;  %s431_s3 = inlined_call_operand.hbm [shape: bf16[32,32], index: 3, kind: input, shape index: {}]   ;;  %s432_s4 = inlined_call_operand.vmem [shape: f32[1,32], index: 4, kind: input, shape index: {}]   ;;  %s433_s5 = inlined_call_operand.hbm [shape: f32[16,32], index: 5, kind: output, shape index: {}]  }
   0x1   :  { %11 = vsyncpa [#allocation7], 0 }
   0x2   :  { %12 = vsyncpa [#allocation5], 0  ;;  %s320_s18 = smov [#allocation3]   ;;  %s248_s22 = scalar_lea.hbm %s428_s0, 256 }
   0x3   :  { %s18_s19 = sshll.u32 %s320_s18, 4  ;;  %p249_p0 = scmp.ne.s32.totalorder %s428_s0, %s248_s22  ;;  %s19_s19 = int_to_ptr.vmem [resolvable:$true] %s18_s19 }
   0x4   :  { %p252_p1 = scmp.lt.u32.totalorder %s248_s22, %s428_s0 }
   0x6   :  { %p254_p2 = pnand %p252_p1, %p249_p0 }
   0x8   :  { %257 = shalt.err (!%p254_p2)
}
   0x9   :  { %s258_s27 = scalar_lea.vmem %s19_s19, 256  ;;  %p263_p4 = scmp.lt.s32.totalorder %s19_s19, %s19_s19 }
   0xa   :  { %p259_p3 = scmp.ne.s32.totalorder %s19_s19, %s258_s27  ;;  %p264_p5 = scmp.lt.s32.totalorder %s258_s27, %s258_s27 }
   0xc   :  { %p265_p6 = por %p264_p5, %p263_p4 }
   0xe   :  { %p266_p7 = pnand %p265_p6, %p259_p3 }
  0x10   :  { %269 = shalt.err (!%p266_p7)
}
  0x11   :  { %s321_s28 = smov 128   ;;  %s322_s29 = smov 8  }
  0x12   :  { %24 = dma.hbm_to_vmem [thread:$0]  %s428_s0, 256, %s19_s19, [#allocation4], %s321_s28, %s321_s28, %s322_s29  }
  0x13   :  { %s323_s7 = smov [#allocation6]   ;;  %s270_s11 = scalar_lea.hbm %s431_s3, 256 }
  0x14   :  { %s34_s8 = sshll.u32 %s323_s7, 4  ;;  %p271_p8 = scmp.ne.s32.totalorder %s431_s3, %s270_s11  ;;  %s35_s8 = int_to_ptr.vmem [resolvable:$true] %s34_s8 }
  0x15   :  { %p274_p9 = scmp.lt.u32.totalorder %s270_s11, %s431_s3 }
  0x17   :  { %p276_p10 = pnand %p274_p9, %p271_p8 }
  0x19   :  { %279 = shalt.err (!%p276_p10)
}
  0x1a   :  { %s280_s16 = scalar_lea.vmem %s35_s8, 256  ;;  %p285_p12 = scmp.lt.s32.totalorder %s35_s8, %s35_s8 }
  0x1b   :  { %p281_p11 = scmp.ne.s32.totalorder %s35_s8, %s280_s16  ;;  %p286_p13 = scmp.lt.s32.totalorder %s280_s16, %s280_s16 }
  0x1d   :  { %p287_p0 = por %p286_p13, %p285_p12 }
  0x1f   :  { %p288_p1 = pnand %p287_p0, %p281_p11 }
  0x21   :  { %291 = shalt.err (!%p288_p1)
}
  0x22   :  { %s324_s0 = smov 64   ;;  %s325_s17 = smov 4  }
  0x23   :  { %40 = dma.hbm_to_vmem [thread:$0]  %s431_s3, 256, %s35_s8, [#allocation7], %s324_s0, %s324_s0, %s325_s17  }
  0x24   :  { %314 = dma.done.wait [#allocation4], 256  }
  0x25   :  { %315 = vsyncadd [#allocation4], 4294967040 }
  0x26   :  { %316 = dma.done.wait [#allocation7], 256  }
  0x27   :  { %317 = vsyncadd [#allocation7], 4294967040  ;;  %vm58_vm0 = vcmask 261120   ;;  %v386_v0 = vld [vmem:[#allocation3] sm:$0xff]  ;;  %v388_v1 = vld [vmem:[#allocation3 + $0x8] sm:$0xff]  ;;  %v326_v15 = vmov 0.0  }
  0x28   :  { %v59_v2 = vsel %vm58_vm0, %v386_v0, 0.0  ;;  %v62_v3 = vsel %vm58_vm0, %v388_v1, 0.0  ;;  %v238_v14 = vld [vmem:[#allocation6] sm:$0xff]   ;;  %221 = vmatprep.subr.bf16.mxu0 %v326_v15  ;;  %v239_v16 = vld [vmem:[#allocation6 + $0x8] sm:$0xff]   ;;  %vm327_vm1 = vmmov 0   ;;  %s328_s24 = smov [#allocation8]  }
  0x29   :  { %60 = vadd.xlane.f32.xlu0 %v59_v2  ;;  %222 = vmatpush3.bf16.msra.mxu0 %v238_v14  ;;  %v212_v33 = vld [vmem:[%s429_s1] ss:$0 sm:$0xff]  ;;  %s199_s25 = sshll.u32 %s328_s24, 4  ;;  %s200_s25 = int_to_ptr.vmem [resolvable:$true] %s199_s25 }
  0x2a   :  { %225 = vmatprep.mubr.msk.bf16.mxu0 %vm327_vm1, %v326_v15  ;;  %223 = vmatprep.subr.bf16.mxu0 %v326_v15  ;;  %v213_v39 = vld [vmem:[%s430_s2] ss:$0 sm:$0xff]  ;;  %s292_s2 = scalar_lea.vmem %s200_s25, 256  ;;  %p297_p3 = scmp.lt.s32.totalorder %s200_s25, %s200_s25 }
  0x2b   :  { %v214_v45 = vld [vmem:[%s432_s4] ss:$0 sm:$0xff]  ;;  %p293_p2 = scmp.ne.s32.totalorder %s200_s25, %s292_s2  ;;  %p298_p4 = scmp.lt.s32.totalorder %s292_s2, %s292_s2 }
  0x2d   :  { %63 = vadd.xlane.f32.xlu0 %v62_v3  ;;  %224 = vmatpush3.bf16.msra.mxu0 %v239_v16  ;;  %p299_p5 = por %p298_p4, %p297_p3 }
  0x2f   :  { %p300_p6 = pnand %p299_p5, %p293_p2 }
  0xb6   :  { %v61_v4 = vpop.xlane.xlu0 %60 }
  0xb7   :  { %v66_v5 = vmul.f32 0.03125, %v61_v4 }
  0xb9   :  { %v68_v6 = vsub.f32 %v386_v0, %v66_v5 }
  0xba   :  { %v64_v7 = vpop.xlane.xlu0 %63 }
  0xbb   :  { %v67_v8 = vmul.f32 0.03125, %v64_v7  ;;  %v70_v9 = vmul.f32 %v68_v6, %v68_v6  ;;  %v105_v35 = vmul.f32 %v212_v33, %v68_v6 }
  0xbd   :  { %v69_v10 = vsub.f32 %v388_v1, %v67_v8  ;;  %v72_v11 = vsel %vm58_vm0, %v70_v9, 0.0 }
  0xbe   :  { %73 = vadd.xlane.f32.xlu1 %v72_v11 }
  0xbf   :  { %v71_v12 = vmul.f32 %v69_v10, %v69_v10  ;;  %v106_v36 = vmul.f32 %v212_v33, %v69_v10 }
  0xc1   :  { %v75_v13 = vsel %vm58_vm0, %v71_v12, 0.0 }
  0xc2   :  { %76 = vadd.xlane.f32.xlu1 %v75_v13 }
 0x14b   :  { %v74_v17 = vpop.xlane.xlu1 %73 }
 0x14c   :  { %v79_v18 = vmul.f32 0.032258064, %v74_v17 }
 0x14e   :  { %240 = vrsqrt.f32 %v79_v18  ;;  %vm83_vm2 = vcmp.eq.f32.partialorder %v79_v18, inf  ;;  %v86_v23 = vand.u32 2147483648, %v79_v18  ;;  %vm85_vm3 = vcmp.eq.f32.partialorder %v79_v18, 0.0 }
 0x14f   :  { %v77_v19 = vpop.xlane.xlu1 %76 }
 0x150   :  { %v80_v20 = vmul.f32 0.032258064, %v77_v19 }
 0x152   :  { %242 = vrsqrt.f32 %v80_v20  ;;  %vm90_vm4 = vcmp.eq.f32.partialorder %v80_v20, inf  ;;  %v93_v29 = vand.u32 2147483648, %v80_v20  ;;  %vm92_vm5 = vcmp.eq.f32.partialorder %v80_v20, 0.0 }
 0x158   :  { %v241_v21 = vpop.eup %240 }
 0x159   :  { %v82_v22 = vmul.f32 %v241_v21, %v79_v18 }
 0x15b   :  { %v84_v24 = vsel %vm83_vm2, %v79_v18, %v82_v22 }
 0x15c   :  { %v243_v25 = vpop.eup %242  ;;  %v87_v26 = vsel %vm85_vm3, %v86_v23, %v84_v24 }
 0x15d   :  { %v95_v27 = vadd.f32 1e-06, %v87_v26  ;;  %v89_v28 = vmul.f32 %v243_v25, %v80_v20 }
 0x15f   :  { %244 = vrcp.f32 %v95_v27  ;;  %v91_v30 = vsel %vm90_vm4, %v80_v20, %v89_v28 }
 0x160   :  { %v94_v31 = vsel %vm92_vm5, %v93_v29, %v91_v30 }
 0x161   :  { %v96_v32 = vadd.f32 1e-06, %v94_v31 }
 0x163   :  { %246 = vrcp.f32 %v96_v32 }
 0x169   :  { %v245_v34 = vpop.eup %244 }
 0x16a   :  { %v107_v37 = vmul.f32 %v245_v34, %v105_v35 }
 0x16c   :  { %v115_v41 = vadd.f32 %v213_v39, %v107_v37 }
 0x16d   :  { %v247_v38 = vpop.eup %246 }
 0x16e   :  { %v108_v40 = vmul.f32 %v247_v38, %v106_v36 }
 0x170   :  { %v116_v42 = vadd.f32 %v213_v39, %v108_v40 }
 0x172   :  { %v117_v43 = vpack.c.bf16 %v116_v42, %v115_v41 }
 0x174   :  { %118 = vst.msk [vmem:[#allocation2] sm:$0xff] %vm58_vm0, %v117_v43 }
 0x17b   :  { %v119_v44 = vld [vmem:[#allocation2] sm:$0xff] }
 0x17c   :  { %226 = vmatmul.mubr.msk.bf16.vlgmr.msra.gmra.mrb[0].mxu0 %vm58_vm0, %v119_v44 }
 0x24f   :  { %v181_v46 = vpop.f32.mrb[0].mxu0 }
 0x250   :  { %v182_v47 = vadd.f32 %v214_v45, %v181_v46  ;;  %v227_v48 = vpop.f32.mrb[1].mxu0 }
 0x251   :  { %v184_v49 = vpop.f32.mrb[2].mxu0 }
 0x252   :  { %v190_v50 = vadd.f32 %v182_v47, %v386_v0  ;;  %v185_v51 = vadd.f32 %v214_v45, %v184_v49  ;;  %v228_v52 = vpop.f32.mrb[3].mxu0 }
 0x254   :  { %192 = vst.msk [vmem:[#allocation8] sm:$0xff] %vm58_vm0, %v190_v50  ;;  %v191_v53 = vadd.f32 %v185_v51, %v388_v1 }
 0x256   :  { %193 = vst.msk [vmem:[#allocation8 + $0x8] sm:$0xff] %vm58_vm0, %v191_v53 }
 0x257   :  { %303 = shalt.err (!%p300_p6)
}
 0x258   :  { %s304_s27 = scalar_lea.hbm %s433_s5, 256 }
 0x259   :  { %p305_p7 = scmp.ne.s32.totalorder %s433_s5, %s304_s27  ;;  %p308_p8 = scmp.lt.u32.totalorder %s304_s27, %s433_s5 }
 0x25b   :  { %p310_p9 = pnand %p308_p8, %p305_p7 }
 0x25d   :  { %313 = shalt.err (!%p310_p9)
}
 0x25e   :  { %205 = dma.vmem_to_hbm [thread:$0]  %s200_s25, 256, %s433_s5, [#allocation5], %s321_s28, %s321_s28, %s322_s29  }
 0x25f   :  { %318 = dma.done.wait [#allocation5], 256  }
 0x260   :  { %319 = vsyncadd [#allocation5], 4294967040 }
 0x261   :  { %209 = vsyncpa [#allocation4], 1 }
 0x262   :  { %210 = vsyncpa [#allocation7], 1 }
 0x263   :  { %211 = vsyncpa [#allocation5], 1 }

</bundles_post_ra>
